<compile_context>
chip_gen: v6e
topology: v6e:2x2x1
jax: 0.10.0
libtpu: 0.0.40
codegen_flags: <defaults>
</compile_context>

<pallas_src>
import functools
import math

import jax
import jax.numpy as jnp
from jax import lax
from jax.experimental import pallas as pl
from jax.experimental.pallas import tpu as pltpu

LANE = 128
SUBLANE = 8


def _round_up(x, m):
    return ((x + m - 1) // m) * m


def _dot_t(a, b):
    # a: (M, K), b: (N, K) -> (M, N). RHS stays in PyTorch (out, in) layout;
    # the MXU consumes the transposed RHS directly (no vxpose, no VMEM temp).
    return lax.dot_general(
        a, b,
        dimension_numbers=(((1,), (1,)), ((), ())),
        preferred_element_type=jnp.float32,
    )


# ----------------------------- kernels ---------------------------------------

def _qnet_train_kernel(x_ref, p_ref, o_ref, *, hidden, out):
    """Training path: weight = mu + sigma * epsilon for both noisy layers."""
    H, O = hidden, out
    x = x_ref[...]                                                   # (TB, IN)

    # Layer 1 noisy weight / bias (all slices are static, tile-aligned rows).
    w1 = p_ref[0:H, :] + p_ref[H:2 * H, :] * p_ref[2 * H:3 * H, :]   # (H, IN)
    r = 3 * H
    b1 = (p_ref[r:r + 1, :H]
          + p_ref[r + 1:r + 2, :H] * p_ref[r + 2:r + 3, :H])         # (1, H)
    h = jnp.maximum(_dot_t(x, w1) + b1, 0.0)                         # (TB, H)

    # Layer 2 noisy weight / bias.
    r += 3
    w2 = (p_ref[r:r + O, :H]
          + p_ref[r + O:r + 2 * O, :H] * p_ref[r + 2 * O:r + 3 * O, :H])  # (O, H)
    r += 3 * O
    b2 = (p_ref[r:r + 1, :O]
          + p_ref[r + 1:r + 2, :O] * p_ref[r + 2:r + 3, :O])         # (1, O)

    if O == 1:
        # Single output unit: a lane reduction (XLU) is cheaper/safer than a
        # degenerate N=1 MXU matmul.
        y = jnp.sum(h * w2, axis=1, keepdims=True) + b2              # (TB, 1)
    else:
        y = _dot_t(h, w2) + b2                                       # (TB, O)
    o_ref[...] = y.astype(o_ref.dtype)


def _qnet_eval_kernel(x_ref, p_ref, o_ref, *, hidden, out):
    """Eval path: weight = weight_mu, bias = bias_mu (no noise streams)."""
    H, O = hidden, out
    x = x_ref[...]
    h = jnp.maximum(_dot_t(x, p_ref[0:H, :]) + p_ref[H:H + 1, :H], 0.0)
    w2 = p_ref[H + 1:H + 1 + O, :H]
    b2 = p_ref[H + 1 + O:H + 2 + O, :O]
    if O == 1:
        y = jnp.sum(h * w2, axis=1, keepdims=True) + b2
    else:
        y = _dot_t(h, w2) + b2
    o_ref[...] = y.astype(o_ref.dtype)


# --------------------------- parameter packing --------------------------------

def pack_qnet_params(p1, p2, training=True):
    """Pack both NoisyLinear layers into ONE lane-aligned (rows, in1) f32 array.

    Call once per noise reset / parameter update, NOT per forward (mirrors
    PyTorch, where reset_noise() materialises the dense weight_epsilon buffer).
    """
    H, in1 = p1["weight_mu"].shape
    O, H2 = p2["weight_mu"].shape
    assert H2 == H, "layer-2 in_features must equal layer-1 out_features"
    assert in1 >= H and in1 >= O, "packing assumes in_features >= hidden >= out"

    def row(v):   # 1-D vector -> (1, in1) zero-padded row
        v = jnp.asarray(v, jnp.float32).reshape(1, -1)
        return jnp.pad(v, ((0, 0), (0, in1 - v.shape[1])))

    def mat(m):   # 2-D (r, c<=in1) -> (r, in1) zero-padded
        m = jnp.asarray(m, jnp.float32)
        return jnp.pad(m, ((0, 0), (0, in1 - m.shape[1])))

    if training:
        # Dense weight_epsilon buffers, exactly as PyTorch's reset_noise().
        weps1 = jnp.outer(p1["eps_out"], p1["eps_in"])
        weps2 = jnp.outer(p2["eps_out"], p2["eps_in"])
        rows = [
            mat(p1["weight_mu"]), mat(p1["weight_sigma"]), mat(weps1),
            row(p1["bias_mu"]), row(p1["bias_sigma"]), row(p1["bias_eps"]),
            mat(p2["weight_mu"]), mat(p2["weight_sigma"]), mat(weps2),
            row(p2["bias_mu"]), row(p2["bias_sigma"]), row(p2["bias_eps"]),
        ]
    else:
        rows = [
            mat(p1["weight_mu"]), row(p1["bias_mu"]),
            mat(p2["weight_mu"]), row(p2["bias_mu"]),
        ]

    pack = jnp.concatenate(rows, axis=0)
    R = _round_up(pack.shape[0], SUBLANE)
    pack = jnp.pad(pack, ((0, R - pack.shape[0]), (0, 0)))
    return dict(pack=pack, in_features=in1, hidden=H, out_features=O,
                training=training)


# ----------------------------- wrapper ----------------------------------------

def q_network_advantage(x, packed, block_b=1024):
    """Pallas implementation of Q_Network.forward: advantage2(relu(advantage1(x)))."""
    pack = packed["pack"]
    in1 = packed["in_features"]
    H = packed["hidden"]
    O = packed["out_features"]
    training = packed["training"]

    x2 = x.reshape(-1, in1).astype(jnp.float32)
    B = x2.shape[0]
    Bmin = _round_up(max(B, 1), SUBLANE)
    block_b = max(SUBLANE, _round_up(block_b, SUBLANE))

    if Bmin <= block_b:
        # One tile would already cover the batch. Split into two tiles when the
        # batch is big enough so both TensorCores get work on v7x (megacore);
        # the extra grid step is ~0.35 us on single-TC chips (negligible).
        TB = Bmin if Bmin < 2 * SUBLANE else _round_up((Bmin + 1) // 2, SUBLANE)
    else:
        TB = block_b
    Bp = _round_up(Bmin, TB)
    xp = jnp.pad(x2, ((0, Bp - B), (0, 0)))

    kern = functools.partial(
        _qnet_train_kernel if training else _qnet_eval_kernel, hidden=H, out=O)

    # Scoped-VMEM guard: v5e's default scoped limit is 16 MiB; only very large
    # batch tiles need an explicit limit (double-buffered x/out + params).
    vmem_bytes = 4 * (2 * TB * (in1 + O) + 2 * pack.shape[0] * pack.shape[1])
    cp_kwargs = dict(dimension_semantics=("parallel",))
    if vmem_bytes > 12 * 1024 * 1024:
        cp_kwargs["vmem_limit_bytes"] = int(min(2 * vmem_bytes, 100 * 1024 * 1024))

    out = pl.pallas_call(
        kern,
        out_shape=jax.ShapeDtypeStruct((Bp, O), jnp.float32),
        grid=(Bp // TB,),
        in_specs=[
            # x: tiled over the batch axis.
            pl.BlockSpec((TB, in1), lambda i: (i, 0)),
            # packed params: replicated (constant index_map -> not re-DMA'd
            # per grid step by the pipeline).
            pl.BlockSpec(pack.shape, lambda i: (0, 0)),
        ],
        # Narrow (Bp, O) output: minimal HBM writeback (no 127 dead lanes).
        out_specs=pl.BlockSpec((TB, O), lambda i: (i, 0)),
        compiler_params=pltpu.CompilerParams(**cp_kwargs),
    )(xp, pack)

    return out[:B, :]


# ----------------------- deterministic parameter setup ------------------------

def _scale_noise(key, size):
    # x = randn(size); x.sign() * sqrt(|x|)
    x = jax.random.normal(key, (size,), dtype=jnp.float32)
    return jnp.sign(x) * jnp.sqrt(jnp.abs(x))


def init_noisy_linear_params(key, in_features, out_features, std_init=0.4):
    k_wmu, k_bmu, k_ein, k_eout, k_beps = jax.random.split(key, 5)
    mu_range = 1.0 / math.sqrt(in_features)

    weight_mu = jax.random.uniform(
        k_wmu, (out_features, in_features), jnp.float32, -mu_range, mu_range)
    weight_sigma = jnp.full((out_features, in_features),
                            std_init / math.sqrt(in_features), jnp.float32)
    bias_mu = jax.random.uniform(
        k_bmu, (out_features,), jnp.float32, -mu_range, mu_range)
    bias_sigma = jnp.full((out_features,),
                          std_init / math.sqrt(out_features), jnp.float32)

    # reset_noise(): factorised Gaussian noise.
    eps_in = _scale_noise(k_ein, in_features)
    eps_out = _scale_noise(k_eout, out_features)
    bias_eps = _scale_noise(k_beps, out_features)

    return dict(weight_mu=weight_mu, weight_sigma=weight_sigma,
                bias_mu=bias_mu, bias_sigma=bias_sigma,
                eps_in=eps_in, eps_out=eps_out, bias_eps=bias_eps)


# ----------------------------- pure-JAX reference ------------------------------

def _noisy_linear_ref(x, p, training):
    if training:
        w = p["weight_mu"] + p["weight_sigma"] * jnp.outer(p["eps_out"], p["eps_in"])
        b = p["bias_mu"] + p["bias_sigma"] * p["bias_eps"]
    else:
        w = p["weight_mu"]
        b = p["bias_mu"]
    return x @ w.T + b


def q_network_advantage_ref(x, p1, p2, training=True):
    x2 = x.reshape(-1, p1["weight_mu"].shape[1])
    h = jax.nn.relu(_noisy_linear_ref(x2, p1, training))
    return _noisy_linear_ref(h, p2, training)


if __name__ == "__main__":
    key = jax.random.PRNGKey(0)
    k1, k2, kx = jax.random.split(key, 3)

    # Q_Network geometry: concat_unit = a_out_unit + feature_out_unit = 64 + 64.
    batch, total_sample = 2, 4
    concat_unit, hidden, out_features = 128, 64, 1

    p1 = init_noisy_linear_params(k1, concat_unit, hidden)     # advantage1
    p2 = init_noisy_linear_params(k2, hidden, out_features)    # advantage2

    # x as it arrives in Q_Network.forward (reshaped to (-1, concat_unit) inside).
    x = jax.random.normal(kx, (batch, total_sample, concat_unit), jnp.float32)

    # Training path (noisy weights). Packing is done once (per noise reset).
    packed_train = pack_qnet_params(p1, p2, training=True)
    y = q_network_advantage(x, packed_train)
    jax.block_until_ready(y)
    assert y.shape == (batch * total_sample, 1)
    y_ref = q_network_advantage_ref(x, p1, p2, training=True)
    assert jnp.allclose(y, y_ref, atol=1e-4, rtol=1e-4), "training path mismatch"

    # Eval path (mu-only kernel).
    packed_eval = pack_qnet_params(p1, p2, training=False)
    y_eval = q_network_advantage(x, packed_eval)
    jax.block_until_ready(y_eval)
    y_eval_ref = q_network_advantage_ref(x, p1, p2, training=False)
    assert jnp.allclose(y_eval, y_eval_ref, atol=1e-4, rtol=1e-4), "eval path mismatch"

    print("KERNEL_OK")
</pallas_src>

<mosaic_0001>
module attributes {stable_mosaic.version = 11 : i64} {
  func.func @_qnet_train_kernel(%arg0: i32, %arg1: memref<8x128xf32, #tpu.memory_space<vmem>>, %arg2: memref<208x128xf32, #tpu.memory_space<vmem>>, %arg3: memref<8x1xf32, #tpu.memory_space<vmem>>) attributes {dimension_semantics = [#tpu.dimension_semantics<parallel>], iteration_bounds = array<i64: 1>, scalar_prefetch = 0 : i64, scratch_operands = 0 : i64, tpu.core_type = #tpu.core_type<tc>, window_params = [{transform_indices = @transform_0, window_bounds = array<i64: 8, 128>}, {pipeline_mode = #tpu.pipeline_mode<synchronous>, transform_indices = @transform_1, window_bounds = array<i64: 208, 128>}, {transform_indices = @transform_2, window_bounds = array<i64: 8, 1>}]} {
    %c0 = arith.constant 0 : index
    %c0_0 = arith.constant 0 : index
    %0 = vector.load %arg1[%c0, %c0_0] : memref<8x128xf32, #tpu.memory_space<vmem>>, vector<8x128xf32>
    %c0_1 = arith.constant 0 : index
    %c0_2 = arith.constant 0 : index
    %1 = vector.load %arg2[%c0_1, %c0_2] : memref<208x128xf32, #tpu.memory_space<vmem>>, vector<64x128xf32>
    %c64 = arith.constant 64 : index
    %c0_3 = arith.constant 0 : index
    %2 = vector.load %arg2[%c64, %c0_3] : memref<208x128xf32, #tpu.memory_space<vmem>>, vector<64x128xf32>
    %c128 = arith.constant 128 : index
    %c0_4 = arith.constant 0 : index
    %3 = vector.load %arg2[%c128, %c0_4] : memref<208x128xf32, #tpu.memory_space<vmem>>, vector<64x128xf32>
    %4 = arith.mulf %2, %3 : vector<64x128xf32>
    %5 = arith.addf %1, %4 : vector<64x128xf32>
    %c192 = arith.constant 192 : index
    %c0_5 = arith.constant 0 : index
    %6 = vector.load %arg2[%c192, %c0_5] : memref<208x128xf32, #tpu.memory_space<vmem>>, vector<1x64xf32>
    %c193 = arith.constant 193 : index
    %c0_6 = arith.constant 0 : index
    %7 = vector.load %arg2[%c193, %c0_6] : memref<208x128xf32, #tpu.memory_space<vmem>>, vector<1x64xf32>
    %c194 = arith.constant 194 : index
    %c0_7 = arith.constant 0 : index
    %8 = vector.load %arg2[%c194, %c0_7] : memref<208x128xf32, #tpu.memory_space<vmem>>, vector<1x64xf32>
    %9 = arith.mulf %7, %8 : vector<1x64xf32>
    %10 = arith.addf %6, %9 : vector<1x64xf32>
    %cst = arith.constant dense<0.000000e+00> : vector<8x64xf32>
    %11 = tpu.matmul %0, %5, %cst {dimension_numbers = #tpu.dot_dimension_numbers<[1], [1], [0], [0], [0, 0, 1, 0], [], []>} : vector<8x128xf32>, vector<64x128xf32>, vector<8x64xf32> -> vector<8x64xf32>
    %12 = vector.broadcast %10 : vector<1x64xf32> to vector<8x64xf32>
    %13 = arith.addf %11, %12 : vector<8x64xf32>
    %cst_8 = arith.constant 0.000000e+00 : f32
    %14 = vector.broadcast %cst_8 : f32 to vector<8x64xf32>
    %15 = arith.maximumf %13, %14 : vector<8x64xf32>
    %c195 = arith.constant 195 : index
    %c0_9 = arith.constant 0 : index
    %16 = vector.load %arg2[%c195, %c0_9] : memref<208x128xf32, #tpu.memory_space<vmem>>, vector<1x64xf32>
    %c196 = arith.constant 196 : index
    %c0_10 = arith.constant 0 : index
    %17 = vector.load %arg2[%c196, %c0_10] : memref<208x128xf32, #tpu.memory_space<vmem>>, vector<1x64xf32>
    %c197 = arith.constant 197 : index
    %c0_11 = arith.constant 0 : index
    %18 = vector.load %arg2[%c197, %c0_11] : memref<208x128xf32, #tpu.memory_space<vmem>>, vector<1x64xf32>
    %19 = arith.mulf %17, %18 : vector<1x64xf32>
    %20 = arith.addf %16, %19 : vector<1x64xf32>
    %c198 = arith.constant 198 : index
    %c0_12 = arith.constant 0 : index
    %21 = vector.load %arg2[%c198, %c0_12] : memref<208x128xf32, #tpu.memory_space<vmem>>, vector<1x1xf32>
    %c199 = arith.constant 199 : index
    %c0_13 = arith.constant 0 : index
    %22 = vector.load %arg2[%c199, %c0_13] : memref<208x128xf32, #tpu.memory_space<vmem>>, vector<1x1xf32>
    %c200 = arith.constant 200 : index
    %c0_14 = arith.constant 0 : index
    %23 = vector.load %arg2[%c200, %c0_14] : memref<208x128xf32, #tpu.memory_space<vmem>>, vector<1x1xf32>
    %24 = arith.mulf %22, %23 : vector<1x1xf32>
    %25 = arith.addf %21, %24 : vector<1x1xf32>
    %26 = vector.broadcast %20 : vector<1x64xf32> to vector<8x64xf32>
    %27 = arith.mulf %15, %26 : vector<8x64xf32>
    %cst_15 = arith.constant dense<0.000000e+00> : vector<8xf32>
    %28 = vector.multi_reduction <add>, %27, %cst_15 [1] : vector<8x64xf32> to vector<8xf32>
    %29 = vector.shape_cast %28 : vector<8xf32> to vector<8x1xf32>
    %30 = vector.broadcast %25 : vector<1x1xf32> to vector<8x1xf32>
    %31 = arith.addf %29, %30 : vector<8x1xf32>
    %c0_16 = arith.constant 0 : index
    %c0_17 = arith.constant 0 : index
    %32 = vector.load %arg3[%c0_16, %c0_17] : memref<8x1xf32, #tpu.memory_space<vmem>>, vector<8x1xf32>
    tpu.vector_store %arg3[%c0_16, %c0_17], %31 {strides = array<i32>} : memref<8x1xf32, #tpu.memory_space<vmem>>, vector<8x1xf32>,
    return
  }
  func.func @transform_0(%arg0: i32) -> (i32, i32) {
    %c0_i32 = arith.constant 0 : i32
    %c0_i32_0 = arith.constant 0 : i32
    return %arg0, %c0_i32 : i32, i32
  }
  func.func @transform_1(%arg0: i32) -> (i32, i32) {
    %c0_i32 = arith.constant 0 : i32
    %c0_i32_0 = arith.constant 0 : i32
    %c0_i32_1 = arith.constant 0 : i32
    return %c0_i32, %c0_i32_0 : i32, i32
  }
  func.func @transform_2(%arg0: i32) -> (i32, i32) {
    %c0_i32 = arith.constant 0 : i32
    %c0_i32_0 = arith.constant 0 : i32
    return %arg0, %c0_i32 : i32, i32
  }
}

</mosaic_0001>

<bundles_post_ra>
// kernel: tpu_custom_call.1
= control target key start
LH: loop header
LB: loop body
LE: loop exit
PB: predicated region body
PF: predicated region fallthrough
CT: control target
= control target key end

     0   :  { %7 = vsyncpa [#allocation3], 0  ;;  %s298_s0 = inlined_call_operand.hbm [shape: f32[8,128], index: 0, kind: input, shape index: {}]   ;;  %s299_s1 = inlined_call_operand.hbm [shape: f32[208,128], index: 1, kind: input, shape index: {}]   ;;  %s300_s2 = inlined_call_operand.vmem [shape: f32[8,1], index: 2, kind: output, shape index: {}]  }
   0x1   :  { %8 = vsyncpa [#allocation5], 0  ;;  %s268_s9 = smov [#allocation2]   ;;  %s269_s11 = smov [#allocation4]  }
   0x2   :  { %s15_s10 = sshll.u32 %s268_s9, 4  ;;  %s24_s12 = sshll.u32 %s269_s11, 4  ;;  %s16_s10 = int_to_ptr.vmem [resolvable:$true] %s15_s10  ;;  %s25_s12 = int_to_ptr.vmem [resolvable:$true] %s24_s12 }
   0x3   :  { %s232_s13 = scalar_lea.vmem %s16_s10, 128  ;;  %p237_p1 = scmp.lt.s32.totalorder %s16_s10, %s16_s10 }
   0x4   :  { %p233_p0 = scmp.ne.s32.totalorder %s16_s10, %s232_s13  ;;  %p238_p2 = scmp.lt.s32.totalorder %s232_s13, %s232_s13 }
   0x6   :  { %p239_p3 = por %p238_p2, %p237_p1 }
   0x8   :  { %p240_p4 = pnand %p239_p3, %p233_p0 }
   0xa   :  { %243 = shalt.err (!%p240_p4)
}
   0xb   :  { %18 = dma.hbm_to_vmem [thread:$0]  %s298_s0, 128, %s16_s10, [#allocation3]  }
   0xc   :  { %s252_s16 = scalar_lea.vmem %s25_s12, 3328  ;;  %p257_p6 = scmp.lt.s32.totalorder %s25_s12, %s25_s12 }
   0xd   :  { %p253_p5 = scmp.ne.s32.totalorder %s25_s12, %s252_s16  ;;  %p258_p7 = scmp.lt.s32.totalorder %s252_s16, %s252_s16 }
   0xf   :  { %p259_p8 = por %p258_p7, %p257_p6 }
  0x11   :  { %p260_p9 = pnand %p259_p8, %p253_p5 }
  0x13   :  { %263 = shalt.err (!%p260_p9)
}
  0x14   :  { %s270_s17 = smov 128   ;;  %s271_s18 = smov 8  }
  0x15   :  { %30 = dma.hbm_to_vmem [thread:$0]  %s299_s1, 3328, %s25_s12, [#allocation5], %s270_s17, %s270_s17, %s271_s18  }
  0x16   :  { %264 = dma.done.wait [#allocation3], 128  }
  0x17   :  { %265 = vsyncadd [#allocation3], 4294967168 }
  0x18   :  { %266 = dma.done.wait [#allocation5], 3328  }
  0x19   :  { %267 = vsyncadd [#allocation5], 4294963968  ;;  %v272_v0 = vmov 0.0   ;;  %vm273_vm0 = vmmov 0   ;;  %v45_v1 = vld [vmem:[#allocation4 + $0x38] sm:$0xff]  ;;  %v52_v5 = vld [vmem:[#allocation4 + $0x70] sm:$0xff]  ;;  %v83_v42 = vlaneseq }
  0x1a   :  { %199 = vmatprep.subr.mxu0 %v272_v0  ;;  %215 = vmatprep.mubr.msk.f32.mxu0 %vm273_vm0, %v272_v0  ;;  %v53_v2 = vld [vmem:[#allocation4 + $0x78] sm:$0xff]  ;;  %v60_v6 = vld [vmem:[#allocation4 + $0xb0] sm:$0xff]  ;;  %v51_v9 = vld [vmem:[#allocation4 + $0x68] sm:$0xff]  ;;  %vm173_vm1 = vcmask 523264   ;;  %vm182_vm2 = vcmask 7168  }
  0x1b   :  { %v61_v3 = vld [vmem:[#allocation4 + $0xb8] sm:$0xff]  ;;  %v44_v7 = vld [vmem:[#allocation4 + $0x30] sm:$0xff]  ;;  %v68_v8 = vmul.f32 %v60_v6, %v52_v5  ;;  %v59_v10 = vld [vmem:[#allocation4 + $0xa8] sm:$0xff]  ;;  %v84_v46 = vshrl.u32 %v83_v42, 7 }
  0x1c   :  { %v69_v4 = vmul.f32 %v61_v3, %v53_v2  ;;  %v67_v13 = vmul.f32 %v59_v10, %v51_v9  ;;  %v43_v14 = vld [vmem:[#allocation4 + $0x28] sm:$0xff]  ;;  %v50_v15 = vld [vmem:[#allocation4 + $0x60] sm:$0xff]  ;;  %v49_v20 = vld [vmem:[#allocation4 + $0x58] sm:$0xff] }
  0x1d   :  { %v76_v12 = vadd.f32 %v68_v8, %v44_v7  ;;  %v58_v16 = vld [vmem:[#allocation4 + $0xa0] sm:$0xff]  ;;  %v57_v21 = vld [vmem:[#allocation4 + $0x98] sm:$0xff]  ;;  %v48_v25 = vld [vmem:[#allocation4 + $0x50] sm:$0xff]  ;;  %v85_v51 = vsub.s32 0, %v84_v46 }
  0x1e   :  { %v77_v11 = vadd.f32 %v69_v4, %v45_v1  ;;  %v75_v17 = vadd.f32 %v67_v13, %v43_v14  ;;  %v66_v18 = vmul.f32 %v58_v16, %v50_v15  ;;  %v42_v19 = vld [vmem:[#allocation4 + $0x20] sm:$0xff]  ;;  %v65_v23 = vmul.f32 %v57_v21, %v49_v20  ;;  %v41_v24 = vld [vmem:[#allocation4 + $0x18] sm:$0xff]  ;;  %v56_v26 = vld [vmem:[#allocation4 + $0x90] sm:$0xff] }
  0x1f   :  { %v64_v28 = vmul.f32 %v56_v26, %v48_v25  ;;  %v40_v29 = vld [vmem:[#allocation4 + $0x10] sm:$0xff]  ;;  %v47_v30 = vld [vmem:[#allocation4 + $0x48] sm:$0xff]  ;;  %v46_v35 = vld [vmem:[#allocation4 + $0x40] sm:$0xff] }
  0x20   :  { %200 = vmatpush3.xpose.msra.mxu0 %v77_v11  ;;  %v74_v22 = vadd.f32 %v66_v18, %v42_v19  ;;  %v73_v27 = vadd.f32 %v65_v23, %v41_v24  ;;  %v55_v31 = vld [vmem:[#allocation4 + $0x88] sm:$0xff]  ;;  %v54_v36 = vld [vmem:[#allocation4 + $0x80] sm:$0xff]  ;;  %v37_v41 = vld [vmem:[#allocation2] sm:$0xff] }
  0x21   :  { %201 = vmatprep.subr.mxu0 %v272_v0  ;;  %v72_v32 = vadd.f32 %v64_v28, %v40_v29  ;;  %v63_v33 = vmul.f32 %v55_v31, %v47_v30  ;;  %v39_v34 = vld [vmem:[#allocation4 + $0x8] sm:$0xff]  ;;  %v62_v38 = vmul.f32 %v54_v36, %v46_v35  ;;  %v38_v39 = vld [vmem:[#allocation4] sm:$0xff] }
  0x22   :  { %v79_v43 = vld [vmem:[#allocation4 + $0xc1] sm:$0x1]  ;;  %v80_v44 = vld [vmem:[#allocation4 + $0xc2] sm:$0x1]  ;;  %v78_v47 = vld [vmem:[#allocation4 + $0xc0] sm:$0x1] }
  0x23   :  { %v71_v37 = vadd.f32 %v63_v33, %v39_v34  ;;  %v70_v40 = vadd.f32 %v62_v38, %v38_v39  ;;  %v81_v45 = vmul.f32 %v80_v44, %v79_v43  ;;  %v159_v48 = vld [vmem:[#allocation4 + $0xc4] sm:$0x1]  ;;  %v160_v49 = vld [vmem:[#allocation4 + $0xc5] sm:$0x1]  ;;  %v158_v53 = vld [vmem:[#allocation4 + $0xc3] sm:$0x1] }
  0x24   :  { %202 = vmatpush3.xpose.msra.mxu0 %v76_v12  ;;  %v161_v52 = vmul.f32 %v160_v49, %v159_v48  ;;  %v164_v63 = vld [vmem:[#allocation4 + $0xc7] sm:$0x1]  ;;  %v163_v2 = vld [vmem:[#allocation4 + $0xc6] sm:$0x1] }
  0x25   :  { %203 = vmatprep.subr.mxu0 %v272_v0  ;;  %v82_v50 = vadd.f32 %v81_v45, %v78_v47 }
  0x26   :  { %v162_v55 = vadd.f32 %v161_v52, %v158_v53 }
  0x27   :  { %v86_v54 = vrot.slane %v82_v50, %v85_v51 }
  0x28   :  { %204 = vmatpush3.xpose.msra.mxu0 %v75_v17  ;;  %v171_v58 = vrot.slane %v162_v55, %v85_v51 }
  0x29   :  { %205 = vmatprep.subr.mxu0 %v272_v0 }
  0x2c   :  { %206 = vmatpush3.xpose.msra.mxu0 %v74_v22 }
  0x2d   :  { %207 = vmatprep.subr.mxu0 %v272_v0 }
  0x30   :  { %208 = vmatpush3.xpose.msra.mxu0 %v73_v27 }
  0x31   :  { %209 = vmatprep.subr.mxu0 %v272_v0 }
  0x34   :  { %210 = vmatpush3.xpose.msra.mxu0 %v72_v32 }
  0x35   :  { %211 = vmatprep.subr.mxu0 %v272_v0 }
  0x38   :  { %212 = vmatpush3.xpose.msra.mxu0 %v71_v37 }
  0x39   :  { %213 = vmatprep.subr.mxu0 %v272_v0  ;;  %v165_v0 = vld [vmem:[#allocation4 + $0xc8] sm:$0x1] }
  0x3a   :  { %v166_v1 = vmul.f32 %v165_v0, %v164_v63 }
  0x3c   :  { %214 = vmatpush3.xpose.msra.mxu0 %v70_v40  ;;  %v167_v3 = vadd.f32 %v166_v1, %v163_v2 }
  0x3e   :  { %v180_v4 = vrot.slane %v167_v3, %v85_v51 }
  0x3f   :  { %216 = vmatmul.mubr.f32.vlgmr.msra.gmra.mxu0 %v37_v41 }
  0xff   :  { %v153_v56 = vpop.f32.mrf.mxu0 }
 0x100   :  { %v154_v57 = vadd.f32 %v153_v56, %v86_v54 }
 0x101   :  { %v217_v59 = vpop.f32.mrf.mxu0 }
 0x102   :  { %v157_v60 = vmax.f32 %v154_v57, 0.0 }
 0x104   :  { %v172_v61 = vmul.f32 %v171_v58, %v157_v60 }
 0x106   :  { %v174_v62 = vsel %vm173_vm1, %v172_v61, 0.0 }
 0x107   :  { %175 = vadd.xlane.f32.xlu0 %v174_v62 }
 0x190   :  { %v176_v5 = vpop.xlane.xlu0 %175 }
 0x191   :  { %v181_v6 = vadd.f32 %v180_v4, %v176_v5 }
 0x193   :  { %183 = vst.msk [vmem:[%s300_s2] sm:$0xff] %vm182_vm2, %v181_v6 }
 0x194   :  { %188 = vsyncpa [#allocation3], 1 }
 0x195   :  { %189 = vsyncpa [#allocation5], 1 }

</bundles_post_ra>
